<compile_context>
chip_gen: v7x
topology: tpu7x:2x2x1
jax: 0.10.0
libtpu: 0.0.40
codegen_flags: <defaults>
</compile_context>

<pallas_src>
import functools
from typing import NamedTuple

import numpy as np
import jax
import jax.numpy as jnp
from jax.experimental import pallas as pl
from jax.experimental.pallas import tpu as pltpu


def _round_up(x: int, m: int) -> int:
    return ((x + m - 1) // m) * m


def _cdiv(a: int, b: int) -> int:
    return (a + b - 1) // b


class SparseFCParams(NamedTuple):
    """Init-time prepared parameters (hoisted out of the per-call path)."""
    w: jax.Array          # (Op, Ip) padded dense weight, compute dtype
    b: jax.Array          # (Op, 1)  padded bias, float32 (f32 epilogue)
    row_cnt: jax.Array    # (Ot,)    int32: # nonzero K-blocks per O-tile row
    blk_k: jax.Array      # (Ot*kmax,) int32: compacted K-block indices
    n_outputs: int
    n_inputs: int
    tm: int
    tk: int
    kmax: int
    total_blocks: int     # sum(row_cnt), for the cost estimate


def prepare_sparse_fc_params(indices, values, shape, biases=None, *,
                             tm: int = 512, tk: int = 1024,
                             compute_dtype=jnp.bfloat16) -> SparseFCParams:
    """One-time parameter prep (equivalent to the module's __init__).

    indices: (2, nnz) COO coordinates (coalesced). values: (nnz,) floats.
    shape: (n_outputs, n_inputs). biases: optional (n_outputs, 1), default zeros.
    """
    O, I = int(shape[0]), int(shape[1])
    indices = np.asarray(indices)
    values = np.asarray(values, dtype=np.float32)

    # Densify the coalesced COO weight.  Element-level sparsity is handled as
    # dense MXU tiles; whole all-zero (tm, tk) tiles are skipped at runtime.
    w_dense = np.zeros((O, I), dtype=np.float32)
    if values.size:
        w_dense[indices[0], indices[1]] = values

    tm = min(tm, _round_up(O, 8))
    tk = min(tk, _round_up(I, 128))
    Op, Ip = _round_up(O, tm), _round_up(I, tk)
    Ot, Kt = Op // tm, Ip // tk

    wp = np.zeros((Op, Ip), dtype=np.float32)
    wp[:O, :I] = w_dense

    # Block-sparsity metadata: for each O-tile row, the compacted list of
    # K-tiles containing at least one nonzero.  Tail entries repeat the last
    # valid index so trailing (skipped) grid steps re-use the resident tile
    # (no extra DMA, matmul skipped in-kernel).
    nz = wp.reshape(Ot, tm, Kt, tk).any(axis=(1, 3))     # (Ot, Kt) bool
    row_cnt = nz.sum(axis=1).astype(np.int32)            # (Ot,)
    kmax = max(1, int(row_cnt.max())) if Ot else 1
    blk_k = np.zeros((Ot, kmax), dtype=np.int32)
    for r in range(Ot):
        ks = np.flatnonzero(nz[r]).astype(np.int32)
        if ks.size:
            blk_k[r, :ks.size] = ks
            blk_k[r, ks.size:] = ks[-1]

    if biases is None:
        b = np.zeros((O, 1), dtype=np.float32)            # module default: zeros
    else:
        b = np.asarray(biases, dtype=np.float32).reshape(O, 1)
    bp = np.zeros((Op, 1), dtype=np.float32)
    bp[:O] = b

    return SparseFCParams(
        w=jnp.asarray(wp).astype(compute_dtype),
        b=jnp.asarray(bp),
        row_cnt=jnp.asarray(row_cnt),
        blk_k=jnp.asarray(blk_k.reshape(-1)),
        n_outputs=O, n_inputs=I, tm=tm, tk=tk, kmax=kmax,
        total_blocks=int(row_cnt.sum()),
    )


def _sparse_fc_kernel(row_cnt_ref, blk_k_ref, w_ref, x_ref, b_ref, o_ref,
                      acc_ref, *, activation):
    i = pl.program_id(0)          # O-tile
    g = pl.program_id(2)          # position in this row's compacted K-block list

    @pl.when(g == 0)
    def _init():
        acc_ref[...] = jnp.zeros_like(acc_ref)

    # Ragged K: only the first row_cnt[i] steps carry real (nonzero) W tiles;
    # tail steps re-present the previous tile (no DMA) and are skipped here.
    @pl.when(g < row_cnt_ref[i])
    def _compute():
        acc_ref[...] += jnp.dot(w_ref[...], x_ref[...],
                                preferred_element_type=jnp.float32)

    @pl.when(g == pl.num_programs(2) - 1)
    def _finalize():
        # Epilogue in f32 (v5e VPU has no bf16); bias broadcast over lanes.
        acc = acc_ref[...] + b_ref[...]
        if activation == "relu":
            acc = jnp.maximum(acc, 0.0)
        elif callable(activation):
            # NOTE: must be purely elementwise — it is applied per (tm, tn) tile.
            acc = activation(acc)
        o_ref[...] = acc.astype(o_ref.dtype)


def sparse_fc_forward(params: SparseFCParams, inputs, activation=None, *,
                      tn: int = 512):
    """inputs: (n_inputs, batch). Returns (n_outputs, batch) in inputs.dtype."""
    I, B = inputs.shape
    assert I == params.n_inputs, "inputs.shape[0] must match weights.shape[1]"
    out_dtype = inputs.dtype
    tm, tk, kmax = params.tm, params.tk, params.kmax
    Op, Ip = params.w.shape
    Ot = Op // tm

    Bmin = _round_up(B, 128)
    tn = min(tn, Bmin)
    # Megacore (v7x): for single-O-tile layers make sure the batch axis yields
    # >=2 parallel tiles when it can (harmless on single-TC v5e/v6e).
    if Ot == 1 and Bmin >= 256 and Bmin // tn < 2:
        tn = _round_up(_cdiv(Bmin, 2), 128)
    Bp = _round_up(B, tn)
    Bt = Bp // tn

    x = inputs.astype(params.w.dtype)
    if (Ip, Bp) != (I, B):
        x = jnp.pad(x, ((0, Ip - I), (0, Bp - B)))

    grid = (Ot, Bt, kmax)
    kernel = functools.partial(_sparse_fc_kernel, activation=activation)

    w_isz = params.w.dtype.itemsize
    x_isz = x.dtype.itemsize
    o_isz = jnp.dtype(out_dtype).itemsize
    cost = pl.CostEstimate(
        flops=2 * params.total_blocks * tm * tk * tn * Bt,
        transcendentals=0,
        bytes_accessed=(params.total_blocks * tm * tk * w_isz * Bt
                        + params.total_blocks * tk * tn * x_isz * Bt
                        + Op * Bp * o_isz + Op * 4),
    )
    # Double-buffered VMEM footprint; budget for v7x's 32 MiB scoped default.
    vmem_bytes = (2 * tm * tk * w_isz + 2 * tk * tn * x_isz
                  + 2 * tm * tn * o_isz + tm * tn * 4 + 2 * tm * 4)
    vmem_limit = min(max(int(vmem_bytes * 1.25) + (2 << 20), 16 << 20), 32 << 20)

    out = pl.pallas_call(
        kernel,
        out_shape=jax.ShapeDtypeStruct((Op, Bp), out_dtype),
        grid_spec=pltpu.PrefetchScalarGridSpec(
            num_scalar_prefetch=2,          # row_cnt, blk_k -> SMEM
            grid=grid,
            in_specs=[
                # W tile: walk only this row's nonzero K-blocks.
                pl.BlockSpec((tm, tk),
                             lambda i, j, g, rc, bk: (i, bk[i * kmax + g])),
                # X tile: the matching K-block of the inputs.
                pl.BlockSpec((tk, tn),
                             lambda i, j, g, rc, bk: (bk[i * kmax + g], j)),
                # Bias tile: depends only on the O-tile.
                pl.BlockSpec((tm, 1), lambda i, j, g, rc, bk: (i, 0)),
            ],
            out_specs=pl.BlockSpec((tm, tn), lambda i, j, g, rc, bk: (i, j)),
            scratch_shapes=[pltpu.VMEM((tm, tn), jnp.float32)],
        ),
        compiler_params=pltpu.CompilerParams(
            dimension_semantics=("parallel", "parallel", "arbitrary"),
            vmem_limit_bytes=vmem_limit,
        ),
        cost_estimate=cost,
    )(params.row_cnt, params.blk_k, params.w, x, params.b)

    if (Op, Bp) != (params.n_outputs, B):
        out = out[:params.n_outputs, :B]
    return out


if __name__ == "__main__":
    # Small deterministic example.  Tiles are shrunk (tm=16, tk=128) so the
    # ragged block-skipping path is actually exercised at these shapes.
    n_outputs, n_inputs, batch = 48, 384, 16
    tm, tk = 16, 128

    key = jax.random.PRNGKey(0)
    kw, kmask, kx, kb = jax.random.split(key, 4)

    # Build a "sparse" weight: ~50% element sparsity plus several whole
    # (tm, tk) tiles zeroed so some K-blocks are skipped entirely.
    w_vals = jax.random.normal(kw, (n_outputs, n_inputs), dtype=jnp.float32)
    elem_mask = jax.random.bernoulli(kmask, p=0.5, shape=(n_outputs, n_inputs))
    w_np = np.array(jnp.where(elem_mask, w_vals, 0.0))
    w_np[0 * tm:1 * tm, 1 * tk:2 * tk] = 0.0
    w_np[1 * tm:2 * tm, 0 * tk:1 * tk] = 0.0
    w_np[1 * tm:2 * tm, 2 * tk:3 * tk] = 0.0
    w_np[2 * tm:3 * tm, 2 * tk:3 * tk] = 0.0

    # COO form (what the module's __init__ receives, coalesced).
    rows, cols = np.nonzero(w_np)
    coo_indices = np.stack([rows, cols])
    coo_values = w_np[rows, cols]

    biases = 0.1 * jax.random.normal(kb, (n_outputs, 1), dtype=jnp.float32)
    x = jax.random.normal(kx, (n_inputs, batch), dtype=jnp.float32)

    w_dense = jnp.asarray(w_np)
    # High-precision host reference for the strict f32 path.
    ref_f64 = (w_np.astype(np.float64) @ np.array(x, dtype=np.float64)
               + np.array(biases, dtype=np.float64))
    ref_f32 = jnp.asarray(ref_f64.astype(np.float32))

    # Default fast path: bf16 MXU operands, f32 accumulation & epilogue.
    params_bf16 = prepare_sparse_fc_params(
        coo_indices, coo_values, (n_outputs, n_inputs), biases,
        tm=tm, tk=tk, compute_dtype=jnp.bfloat16)
    out_bf16 = jax.block_until_ready(sparse_fc_forward(params_bf16, x))
    ref_bf16 = (jnp.dot(w_dense.astype(jnp.bfloat16), x.astype(jnp.bfloat16),
                        preferred_element_type=jnp.float32) + biases)
    assert out_bf16.shape == (n_outputs, batch)
    assert jnp.allclose(out_bf16, ref_bf16.astype(out_bf16.dtype),
                        atol=1e-2, rtol=1e-2), "bf16 path mismatch"

    # Strict-parity path: f32 operands (matches torch.sparse.addmm semantics).
    params_f32 = prepare_sparse_fc_params(
        coo_indices, coo_values, (n_outputs, n_inputs), biases,
        tm=tm, tk=tk, compute_dtype=jnp.float32)
    out_f32 = jax.block_until_ready(sparse_fc_forward(params_f32, x))
    assert jnp.allclose(out_f32, ref_f32, atol=1e-4, rtol=1e-4), "f32 path mismatch"

    # Optional activation path (e.g. activation=torch.relu in the module).
    out_relu = jax.block_until_ready(
        sparse_fc_forward(params_f32, x, activation="relu"))
    assert jnp.allclose(out_relu, jnp.maximum(ref_f32, 0.0),
                        atol=1e-4, rtol=1e-4), "relu path mismatch"

    print("KERNEL_OK")
</pallas_src>

<mosaic_0001>
module attributes {stable_mosaic.version = 11 : i64} {
  func.func @_sparse_fc_kernel(%arg0: i32, %arg1: i32, %arg2: i32, %arg3: memref<3xi32, #tpu.memory_space<smem>>, %arg4: memref<6xi32, #tpu.memory_space<smem>>, %arg5: memref<16x128xbf16, #tpu.memory_space<vmem>>, %arg6: memref<128x128xbf16, #tpu.memory_space<vmem>>, %arg7: memref<16x1xf32, #tpu.memory_space<vmem>>, %arg8: memref<16x128xf32, #tpu.memory_space<vmem>>, %arg9: memref<16x128xf32, #tpu.memory_space<vmem>>) attributes {dimension_semantics = [#tpu.dimension_semantics<parallel>, #tpu.dimension_semantics<parallel>, #tpu.dimension_semantics<arbitrary>], iteration_bounds = array<i64: 3, 1, 2>, scalar_prefetch = 2 : i64, scratch_operands = 1 : i64, tpu.core_type = #tpu.core_type<tc>, window_params = [{transform_indices = @transform_0, window_bounds = array<i64: 16, 128>}, {transform_indices = @transform_1, window_bounds = array<i64: 128, 128>}, {transform_indices = @transform_2, window_bounds = array<i64: 16, 1>}, {transform_indices = @transform_3, window_bounds = array<i64: 16, 128>}]} {
    %c0_i32 = arith.constant 0 : i32
    %0 = arith.cmpi eq, %arg2, %c0_i32 : i32
    %1 = arith.extui %0 : i1 to i32
    %c0_i32_0 = arith.constant 0 : i32
    %2 = arith.cmpi ne, %1, %c0_i32_0 : i32
    scf.if %2 {
      %cst = arith.constant 0.000000e+00 : f32
      %11 = vector.broadcast %cst : f32 to vector<16x128xf32>
      %c0 = arith.constant 0 : index
      %c0_3 = arith.constant 0 : index
      %12 = vector.load %arg9[%c0, %c0_3] : memref<16x128xf32, #tpu.memory_space<vmem>>, vector<16x128xf32>
      tpu.vector_store %arg9[%c0, %c0_3], %11 {strides = array<i32>} : memref<16x128xf32, #tpu.memory_space<vmem>>, vector<16x128xf32>,
    } else {
    }
    %3 = arith.index_cast %arg0 : i32 to index
    %4 = memref.load %arg3[%3] : memref<3xi32, #tpu.memory_space<smem>>
    %5 = arith.cmpi slt, %arg2, %4 : i32
    %6 = arith.extui %5 : i1 to i32
    %c0_i32_1 = arith.constant 0 : i32
    %7 = arith.cmpi ne, %6, %c0_i32_1 : i32
    scf.if %7 {
      %c0 = arith.constant 0 : index
      %c0_3 = arith.constant 0 : index
      %11 = vector.load %arg9[%c0, %c0_3] : memref<16x128xf32, #tpu.memory_space<vmem>>, vector<16x128xf32>
      %c0_4 = arith.constant 0 : index
      %c0_5 = arith.constant 0 : index
      %12 = vector.load %arg5[%c0_4, %c0_5] : memref<16x128xbf16, #tpu.memory_space<vmem>>, vector<16x128xbf16>
      %c0_6 = arith.constant 0 : index
      %c0_7 = arith.constant 0 : index
      %13 = vector.load %arg6[%c0_6, %c0_7] : memref<128x128xbf16, #tpu.memory_space<vmem>>, vector<128x128xbf16>
      %cst = arith.constant dense<0.000000e+00> : vector<16x128xf32>
      %14 = tpu.matmul %12, %13, %cst {dimension_numbers = #tpu.dot_dimension_numbers<[1], [0], [0], [1], [0, 0, 1, 1], [], []>} : vector<16x128xbf16>, vector<128x128xbf16>, vector<16x128xf32> -> vector<16x128xf32>
      %15 = arith.addf %11, %14 : vector<16x128xf32>
      %c0_8 = arith.constant 0 : index
      %c0_9 = arith.constant 0 : index
      %16 = vector.load %arg9[%c0_8, %c0_9] : memref<16x128xf32, #tpu.memory_space<vmem>>, vector<16x128xf32>
      tpu.vector_store %arg9[%c0_8, %c0_9], %15 {strides = array<i32>} : memref<16x128xf32, #tpu.memory_space<vmem>>, vector<16x128xf32>,
    } else {
    }
    %c1_i32 = arith.constant 1 : i32
    %8 = arith.cmpi eq, %arg2, %c1_i32 : i32
    %9 = arith.extui %8 : i1 to i32
    %c0_i32_2 = arith.constant 0 : i32
    %10 = arith.cmpi ne, %9, %c0_i32_2 : i32
    scf.if %10 {
      %c0 = arith.constant 0 : index
      %c0_3 = arith.constant 0 : index
      %11 = vector.load %arg9[%c0, %c0_3] : memref<16x128xf32, #tpu.memory_space<vmem>>, vector<16x128xf32>
      %c0_4 = arith.constant 0 : index
      %c0_5 = arith.constant 0 : index
      %12 = vector.load %arg7[%c0_4, %c0_5] : memref<16x1xf32, #tpu.memory_space<vmem>>, vector<16x1xf32>
      %13 = vector.broadcast %12 : vector<16x1xf32> to vector<16x128xf32>
      %14 = arith.addf %11, %13 : vector<16x128xf32>
      %c0_6 = arith.constant 0 : index
      %c0_7 = arith.constant 0 : index
      %15 = vector.load %arg8[%c0_6, %c0_7] : memref<16x128xf32, #tpu.memory_space<vmem>>, vector<16x128xf32>
      tpu.vector_store %arg8[%c0_6, %c0_7], %14 {strides = array<i32>} : memref<16x128xf32, #tpu.memory_space<vmem>>, vector<16x128xf32>,
    } else {
    }
    return
  }
  func.func @transform_0(%arg0: i32, %arg1: i32, %arg2: i32, %arg3: memref<3xi32, #tpu.memory_space<smem>>, %arg4: memref<6xi32, #tpu.memory_space<smem>>) -> (i32, i32) {
    %c2_i32 = arith.constant 2 : i32
    %0 = arith.muli %arg0, %c2_i32 : i32
    %1 = arith.addi %0, %arg2 : i32
    %2 = arith.index_cast %1 : i32 to index
    %3 = memref.load %arg4[%2] : memref<6xi32, #tpu.memory_space<smem>>
    %c0_i32 = arith.constant 0 : i32
    return %arg0, %3 : i32, i32
  }
  func.func @transform_1(%arg0: i32, %arg1: i32, %arg2: i32, %arg3: memref<3xi32, #tpu.memory_space<smem>>, %arg4: memref<6xi32, #tpu.memory_space<smem>>) -> (i32, i32) {
    %c2_i32 = arith.constant 2 : i32
    %0 = arith.muli %arg0, %c2_i32 : i32
    %1 = arith.addi %0, %arg2 : i32
    %2 = arith.index_cast %1 : i32 to index
    %3 = memref.load %arg4[%2] : memref<6xi32, #tpu.memory_space<smem>>
    %c0_i32 = arith.constant 0 : i32
    return %3, %arg1 : i32, i32
  }
  func.func @transform_2(%arg0: i32, %arg1: i32, %arg2: i32, %arg3: memref<3xi32, #tpu.memory_space<smem>>, %arg4: memref<6xi32, #tpu.memory_space<smem>>) -> (i32, i32) {
    %c0_i32 = arith.constant 0 : i32
    %c0_i32_0 = arith.constant 0 : i32
    return %arg0, %c0_i32 : i32, i32
  }
  func.func @transform_3(%arg0: i32, %arg1: i32, %arg2: i32, %arg3: memref<3xi32, #tpu.memory_space<smem>>, %arg4: memref<6xi32, #tpu.memory_space<smem>>) -> (i32, i32) {
    %c0_i32 = arith.constant 0 : i32
    return %arg0, %arg1 : i32, i32
  }
}

</mosaic_0001>

<bundles_post_ra>
// kernel: tpu_custom_call.1
= control target key start
LH: loop header
LB: loop body
LE: loop exit
PB: predicated region body
PF: predicated region fallthrough
CT: control target
= control target key end

     0   :  { %s1543_s0 = inlined_call_operand.vmem [shape: s32[3], index: 0, kind: input, shape index: {}]   ;;  %s1544_s2 = inlined_call_operand.hbm [shape: bf16[48,384], index: 2, kind: input, shape index: {}]   ;;  %s1545_s3 = inlined_call_operand.hbm [shape: bf16[384,128], index: 3, kind: input, shape index: {}]   ;;  %s1546_s4 = inlined_call_operand.vmem [shape: f32[48,1], index: 4, kind: input, shape index: {}]   ;;  %s1547_s5 = inlined_call_operand.hbm [shape: f32[48,128], index: 5, kind: output, shape index: {}]   ;;  %s1548_s1 = inlined_call_operand.vmem [shape: s32[6], index: 1, kind: input, shape index: {}]  }
   0x1   :  { %1561 = sst [smem:[#allocation26_spill]] %s1544_s2  ;;  %s10_s20 = sshll.u32 %s1543_s0, 4  ;;  %s11_s20 = int_to_ptr.vmem [resolvable:$true] %s10_s20 }
   0x2   :  { %1562 = sst [smem:[#allocation27_spill]] %s1546_s4  ;;  %s14_s23 = sshll.u32 %s1548_s1, 4  ;;  %s15_s23 = int_to_ptr.vmem [resolvable:$true] %s14_s23 }
   0x3   :  { %1563 = sst [smem:[#allocation28_spill]] %s1547_s5  ;;  %s846_s24 = scalar_lea.vmem %s11_s20, 16 }
   0x4   :  { %p847_p0 = scmp.ne.s32.totalorder %s11_s20, %s846_s24  ;;  %p851_p1 = scmp.lt.s32.totalorder %s11_s20, %s11_s20 }
   0x5   :  { %p852_p2 = scmp.lt.s32.totalorder %s846_s24, %s846_s24 }
   0x7   :  { %p853_p3 = por %p852_p2, %p851_p1 }
   0x9   :  { %p854_p4 = pnand %p853_p3, %p847_p0 }
   0xb   :  { %857 = shalt.err (!%p854_p4)  }
   0xc   :  { %s1084_s25 = smov [#allocation4]   ;;  %s858_s26 = scalar_lea.vmem %s15_s23, 16 }
   0xd   :  { %13 = dma.vmem_to_smem %s11_s20, 16, %s1084_s25, [#allocation3] }
   0xe   :  { %p859_p5 = scmp.ne.s32.totalorder %s15_s23, %s858_s26  ;;  %p863_p6 = scmp.lt.s32.totalorder %s15_s23, %s15_s23 }
   0xf   :  { %p864_p7 = scmp.lt.s32.totalorder %s858_s26, %s858_s26 }
  0x11   :  { %p865_p8 = por %p864_p7, %p863_p6 }
  0x13   :  { %p866_p9 = pnand %p865_p8, %p859_p5 }
  0x15   :  { %869 = shalt.err (!%p866_p9)  }
  0x16   :  { %s1085_s0 = smov [#allocation5]  }
  0x17   :  { %17 = dma.vmem_to_smem %s15_s23, 16, %s1085_s0, [#allocation3] }
  0x18   :  { %1014 = dma.done.wait [#allocation3], 32 }
  0x19   :  { %1015 = vsyncadd [#allocation3], 4294967264 }
  0x1a   :  { %19 = sfence }
  0x1b   :  { %20 = vsyncpa [#allocation7], 0 }
  0x1c   :  { %22 = vsyncpa [#allocation7 + $0x1], 0 }
  0x1d   :  { %23 = vsyncpa [#allocation10], 0 }
  0x1e   :  { %25 = vsyncpa [#allocation10 + $0x1], 0 }
  0x1f   :  { %26 = vsyncpa [#allocation8], 0 }
  0x20   :  { %28 = vsyncpa [#allocation8 + $0x1], 0  ;;  %s1134_s1 = smov 0   ;;  %s1136_s27 = smov 0  }
  0x21   :  { %s1138_s28 = smov 0   ;;  %s1140_s29 = smov 0  }
  0x22   :  { %s1142_s30 = smov 0   ;;  %s1144_s6 = smov 0  }
  0x23   :  { %s1146_s7 = smov 0   ;;  %s1148_s8 = smov 0  }
  0x24   :  { %s1150_s9 = smov 0   ;;  %s1152_s10 = smov 0  }
  0x25   :  { %s1154_s11 = smov 0   ;;  %s1156_s12 = smov 0  }
  0x26   :  { %s1158_s13 = smov 0   ;;  %s1160_s14 = smov 0  }
  0x27 LB: > { %1564 = sst [smem:[#allocation20_spill]] %s1066_s10  ;;  %s46_s15 = sadd.s32 1, %s1074_s12  ;;  %s1082_s14 = sphi %s1160_s14, %s34_s14   ;;  %s1078_s13 = sphi %s1158_s13, %s1614_s13   ;;  %s1074_s12 = sphi %s1156_s12, %s1603_s12   ;;  %s1070_s11 = sphi %s1154_s11, %s1602_s11   ;;  %s1066_s10 = sphi %s1152_s10, %s1601_s10   ;;  %s1062_s9 = sphi %s1150_s9, %s1613_s9   ;;  %s1058_s8 = sphi %s1148_s8, %s1612_s8   ;;  %s1054_s7 = sphi %s1146_s7, %s1611_s7   ;;  %s1050_s6 = sphi %s1144_s6, %s1610_s6   ;;  %s1046_s30 = sphi %s1142_s30, %s1609_s30   ;;  %s1042_s29 = sphi %s1140_s29, %s1608_s29   ;;  %s1038_s28 = sphi %s1138_s28, %s1607_s28   ;;  %s1034_s27 = sphi %s1136_s27, %s1606_s27   ;;  %s1030_s1 = sphi %s1134_s1, %s1605_s1  }
  0x28   : > { %1565 = sst [smem:[#allocation21_spill]] %s1074_s12  ;;  %s53_s16 = sadd.s32 1, %s1078_s13 }
  0x29   : > { %1566 = sst [smem:[#allocation22_spill]] %s1078_s13  ;;  %p47_p10 = scmp.ge.s32.totalorder %s46_s15, 2 }
  0x2a   : > { %s616_s17 = sshll.u32 %s1078_s13, 1  ;;  %p75_p11 = scmp.ne.s32.totalorder %s1062_s9, %s1058_s8 }
  0x2b   : > { %s1208_s18 = sadd.s32 %s1074_s12, %s616_s17  ;;  %s1616_s15 = smov (%p47_p10, %s46_s15), 0 }
  0x2c   : > { %1567 = sst [smem:[#allocation23_spill]] %s1616_s15  ;;  %s1618_s16 = smov (!%p47_p10, %s53_s16), %s1078_s13 }
  0x2d   : > { %s59_s20 = sld [smem:[#allocation5 + %s1208_s18]]  ;;  %p55_p12 = scmp.ge.s32.totalorder %s1618_s16, 3 }
  0x2e   : > { %p1555_p13 = scmp.eq.s32.totalorder %s1082_s14, 0  ;;  %p1554_p2 = scmp.lt.s32.totalorder %s1082_s14, 6 }
  0x2f   : > { %s1620_s16 = smov (%p55_p12, %s1618_s16), 0  ;;  %s193_s26 = sand.u32 1, %s1062_s9  }
  0x30   : > { %1568 = sst [smem:[#allocation24_spill]] %s1620_s16  ;;  %p1224_p1 = por %p1555_p13, %p75_p11 }
  0x31   : > { %s617_s22 = sshll.u32 %s1620_s16, 1  ;;  %s1232_s23 = ssub.s32 %s1078_s13, %s1620_s16 }
  0x32   : > { %s1235_s24 = sadd.s32 %s617_s22, %s1616_s15  ;;  %s622_s0 = sshll.u32 %s193_s26, 3 }
  0x33   : > { %s62_s25 = sld [smem:[#allocation5 + %s1235_s24]]  ;;  %s685_s17 = smul.u32 6, %s1078_s13 }
  0x34   : > { %s686_s19 = scalar_select %p1224_p1, [#allocation5], [#allocation12] }
  0x35   : > { %s687_s16 = scalar_select %p1224_p1, %s1208_s18, 0 }
  0x36   : > { %s1622_s19 = smov (!%p1554_p2, %s686_s19), [#allocation14]  ;;  %s197_s22 = scalar_lea.vmem [#allocation6], %s622_s0 }
  0x37   : > { %s209_s15 = sshll.u32 %s197_s22, 4  ;;  %p1255_p5 = pnand %p1554_p2, %p1224_p1  ;;  %s1249_s15 = int_to_ptr.vmem [resolvable:$true] %s209_s15 }
  0x38   : > { %s1624_s16 = smov (!%p1554_p2, %s687_s16), 0  ;;  %s1571_s13 = sadd.s32 1, %s1062_s9 }
  0x39   : > { %s64_s12 = ssub.s32 %s59_s20, %s62_s25  ;;  %s200_s20 = sld [smem:[%s1622_s19 + %s1624_s16]] }
  0x3a   : > { %s65_s5 = sor.u32 %s64_s12, %s1232_s23  ;;  %p631_p6 = scmp.ge.s32.totalorder %s1082_s14, 1 }
  0x3b   : > { %p66_p4 = scmp.eq.s32.totalorder %s65_s5, 0  ;;  %p251_p7 = scmp.lt.s32.totalorder %s1082_s14, 7 }
  0x3c   : > { %s1574_s2 = sld [smem:[#allocation26_spill]]  ;;  %p872_p10 = pneg %p1255_p5 }
  0x3d   : > { %s1264_s4 = scalar_select %p66_p4, %s1062_s9, %s1571_s13  }
  0x3e   : > { %p1268_p8 = pnand %p631_p6, %p251_p7  ;;  %s1277_s13 = scalar_lea.sflag [#allocation7], %s193_s26 }
  0x3f   : > { %1572 = sst [smem:[#allocation25_spill]] %s1264_s4  ;;  %s206_s5 = sadd.s32 %s685_s17, %s200_s20 }
  0x40   : > { %s626_s21 = sshll.u32 %s206_s5, 6 }
  0x42   : > { %s1275_s22 = scalar_lea.hbm %s1574_s2, %s626_s21  ;;  %s875_s20 = scalar_lea.hbm %s1574_s2, 1152 }
  0x43   : > { %s870_s16 = scalar_lea.hbm %s1275_s22, 128  ;;  %p876_p1 = scmp.lt.u32.totalorder %s1275_s22, %s1574_s2 }
  0x44   : > { %p871_p9 = scmp.ne.s32.totalorder %s1275_s22, %s870_s16  ;;  %p877_p4 = scmp.lt.u32.totalorder %s875_s20, %s870_s16 }
  0x45   : > { %p879_p7 = scmp.lt.u32.totalorder %s870_s16, %s1275_s22 }
  0x46   : > { %p873_p11 = pnand %p872_p10, %p871_p9  ;;  %p878_p6 = por %p877_p4, %p876_p1 }
  0x48   : > { %p874_p12 = pneg %p873_p11  ;;  %p880_p2 = por %p879_p7, %p878_p6 }
  0x4a   : > { %p881_p3 = pnand %p880_p2, %p874_p12 }
  0x4c   : > { %884 = shalt.err (!%p881_p3)
}
  0x4d   : > { %s885_s26 = scalar_lea.vmem %s1249_s15, 128  ;;  %s1086_s25 = smov [#allocation6]  }
  0x4e   : > { %p886_p9 = scmp.ne.s32.totalorder %s1249_s15, %s885_s26  ;;  %s890_s0 = sshll.u32 %s1086_s25, 4  ;;  %s891_s0 = int_to_ptr.vmem [resolvable:$false] %s890_s0 }
  0x4f   : > { %s892_s19 = scalar_lea.vmem %s891_s0, 256  ;;  %p893_p0 = scmp.lt.s32.totalorder %s1249_s15, %s891_s0 }
  0x50   : > { %p888_p11 = pnand %p886_p9, %p872_p10  ;;  %p894_p1 = scmp.lt.s32.totalorder %s892_s19, %s885_s26 }
  0x52   : > { %p889_p13 = pneg %p888_p11  ;;  %p895_p4 = por %p894_p1, %p893_p0 }
  0x54   : > { %p896_p6 = pnand %p895_p4, %p889_p13 }
  0x56   : > { %899 = shalt.err (!%p896_p6)
}
  0x57   : > { %s1087_s16 = smov 192   ;;  %s1556_s17 = smov 64  }
  0x58   : > { %s1557_s20 = smov 4   ;;  %s614_s5 = sadd.s32 4294967295, %s1082_s14  }
  0x59   : > { %701 = dma.hbm_to_vmem [thread:$0]  (!%p1255_p5), %s1275_s22, 128, %s1249_s15, %s1277_s13, %s1087_s16, %s1556_s17, %s1557_s20  }
  0x5a   : > { %s615_s21 = sadd.s32 4294967294, %s1082_s14   ;;  %p82_p13 = scmp.eq.s32.totalorder %s614_s5, 0 }
  0x5b   : > { %s93_s26 = sld [smem:[#allocation5 + %s1208_s18]]  ;;  %p1575_p0 = scmp.ne.s32.totalorder %s1058_s8, %s1054_s7 }
  0x5c   : > { %s96_s25 = sld [smem:[#allocation5 + %s1235_s24]]  ;;  %s102_s19 = sadd.s32 1, %s1050_s6 }
  0x5d   : > { %p1314_p2 = por %p82_p13, %p1575_p0  ;;  %p109_p3 = scmp.ne.s32.totalorder %s1050_s6, %s1046_s30 }
  0x5e   : > { %p115_p10 = scmp.ne.s32.totalorder %s1046_s30, %s1042_s29  ;;  %s156_s10 = sadd.s32 1, %s1038_s28 }
  0x5f   : > { %s1576_s0 = scalar_select %p1314_p2, 1, 0 }
  0x60   : > { %p166_p5 = scmp.ne.s32.totalorder %s1038_s28, %s1034_s27  ;;  %p1577_p12 = scmp.eq.s32.totalorder %s1082_s14, 0 }
  0x61   : > { %p1332_p9 = por %p115_p10, %p82_p13  ;;  %p1580_p11 = scmp.eq.s32.totalorder %s1232_s23, 0 }
  0x62   : > { %p1328_p7 = por %p109_p3, %p1577_p12  ;;  %s97_s24 = ssub.s32 %s93_s26, %s96_s25 }
  0x63   : > { %s1579_s7 = scalar_select %p1332_p9, 1, 0 }
  0x64   : > { %s1339_s29 = scalar_select %p1580_p11, %s1038_s28, %s156_s10  }
  0x65   : > { %p167_p1 = scmp.eq.s32.totalorder %s614_s5, 5  ;;  %p100_p4 = scmp.eq.s32.totalorder %s97_s24, 0 }
  0x66   : > { %p172_p6 = scmp.ne.s32.totalorder %s1034_s27, %s1030_s1  ;;  %p173_p3 = scmp.eq.s32.totalorder %s615_s21, 5 }
  0x67   : > { %p1343_p0 = por %p167_p1, %p166_p5  ;;  %s219_s17 = sand.u32 1, %s1050_s6  }
  0x68   : > { %s1348_s13 = scalar_select %p100_p4, %s1050_s6, %s102_s19  }
  0x69   : > { %s1581_s22 = scalar_select %p1343_p0, 1, 0 }
  0x6a   : > { %p1350_p12 = por %p173_p3, %p172_p6  ;;  %s627_s23 = sshll.u32 %s219_s17, 6 }
  0x6b   : > { %p1583_p13 = scmp.lt.s32.totalorder %s1082_s14, 6  ;;  %s1626_s18 = smov (!%p1328_p7, %s1208_s18), 0 }
  0x6c   : > { %s1582_s16 = scalar_select %p1350_p12, 1, 0 }
  0x6d   : > { %p1359_p10 = pnand %p1583_p13, %p1328_p7  ;;  %p1585_p5 = pmov %p1583_p13 }
  0x6e   : > { %s689_s5 = scalar_select %p1328_p7, [#allocation5], [#allocation13] }
  0x6f   : > { %p1586_p11 = pmov %p1585_p5  ;;  %s223_s25 = scalar_lea.vmem [#allocation9], %s627_s23 }
  0x70   : > { %s1628_s5 = smov (!%p1585_p5, %s689_s5), [#allocation15]  ;;  %s234_s19 = sshll.u32 %s223_s25, 4  ;;  %s1372_s19 = int_to_ptr.vmem [resolvable:$true] %s234_s19 }
  0x71   : > { %s1630_s18 = smov (!%p1586_p11, %s1626_s18), 0  ;;  %s1379_s15 = scalar_lea.sflag [#allocation10], %s219_s17 }
  0x72   : > { %s226_s21 = sld [smem:[%s1628_s5 + %s1630_s18]]  ;;  %p902_p1 = pneg %p1359_p10 }
  0x73   : > { %s905_s20 = scalar_lea.hbm %s1545_s3, 3072 }
  0x78   : > { %s654_s10 = sshll.u32 %s226_s21, 10 }
  0x79   : > { %s1377_s2 = scalar_lea.hbm %s1545_s3, %s654_s10 }
  0x7a   : > { %s900_s4 = scalar_lea.hbm %s1377_s2, 1024  ;;  %p906_p3 = scmp.lt.u32.totalorder %s1377_s2, %s1545_s3 }
  0x7b   : > { %p901_p7 = scmp.ne.s32.totalorder %s1377_s2, %s900_s4  ;;  %p907_p13 = scmp.lt.u32.totalorder %s905_s20, %s900_s4 }
  0x7c   : > { %p909_p11 = scmp.lt.u32.totalorder %s900_s4, %s1377_s2 }
  0x7d   : > { %p903_p4 = pnand %p902_p1, %p901_p7  ;;  %p908_p5 = por %p907_p13, %p906_p3 }
  0x7f   : > { %p904_p6 = pneg %p903_p4  ;;  %p910_p12 = por %p909_p11, %p908_p5 }
  0x81   : > { %p911_p0 = pnand %p910_p12, %p904_p6 }
  0x83   : > { %914 = shalt.err (!%p911_p0)
}
  0x84   : > { %s915_s17 = scalar_lea.vmem %s1372_s19, 1024  ;;  %s1090_s25 = smov [#allocation9]  }
  0x85   : > { %p916_p7 = scmp.ne.s32.totalorder %s1372_s19, %s915_s17  ;;  %s920_s10 = sshll.u32 %s1090_s25, 4  ;;  %s921_s10 = int_to_ptr.vmem [resolvable:$false] %s920_s10 }
  0x86   : > { %s922_s24 = scalar_lea.vmem %s921_s10, 2048  ;;  %p923_p2 = scmp.lt.s32.totalorder %s1372_s19, %s921_s10 }
  0x87   : > { %p918_p4 = pnand %p916_p7, %p902_p1  ;;  %p924_p3 = scmp.lt.s32.totalorder %s922_s24, %s915_s17 }
  0x89   : > { %p919_p9 = pneg %p918_p4  ;;  %p925_p13 = por %p924_p3, %p923_p2 }
  0x8b   : > { %p926_p5 = pnand %p925_p13, %p919_p9 }
  0x8d   : > { %929 = shalt.err (!%p926_p5)
}
  0x8e   : > { %s1587_s4 = smov 4   ;;  %s1588_s18 = smov 64  }
  0x8f   : > { %706 = dma.hbm_to_vmem [thread:$0]  (!%p1359_p10), %s1377_s2, 1024, %s1372_s19, %s1379_s15, %s1588_s18, %s1588_s18, %s1587_s4  }
  0x90   : > { %255 = sbr.rel (%p1268_p8) target bundleno = 604 (0x25c), region = 32  ;;  %s257_s23 = sand.u32 (!%p1268_p8), 1, %s1058_s8  }
  0x91   : > { %s1413_s20 = sshll.u32 (!%p1268_p8), %s257_s23, 3  ;;  %s258_s5 = scalar_lea.sflag (!%p1268_p8), [#allocation7], %s257_s23 }
  0x92   : > { %s261_s21 = scalar_lea.vmem (!%p1268_p8), [#allocation6], %s1413_s20  ;;  %p1589_p2 = scmp.ne.s32.totalorder (!%p1268_p8), %s1576_s0, 0 }
  0x97   : > { %1017 = dma.done.wait (%p1589_p2), %s258_s5, 128  }
  0x98   : > { %1019 = vsyncadd (%p1589_p2), %s258_s5, 4294967168  ;;  %s266_s26 = sand.u32 1, %s1046_s30   ;;  %p1590_p8 = scmp.ne.s32.totalorder %s1579_s7, 0 }
  0x99   : > { %s633_s2 = sshll.u32 %s266_s26, 6  ;;  %s267_s19 = scalar_lea.sflag [#allocation10], %s266_s26 }
  0x9a   : > { %s1421_s12 = scalar_lea.vmem [#allocation9], %s633_s2 }
  0x9b   : > { %1021 = dma.done.wait (%p1590_p8), %s267_s19, 1024  }
  0x9c   : > { %1023 = vsyncadd (%p1590_p8), %s267_s19, 4294966272  ;;  %s300_s15 = sand.u32 1, %s1034_s27   ;;  %s635_s17 = sshll.u32 %s1070_s11, 1 }
  0x9d   : > { %s634_s0 = sshll.u32 %s300_s15, 4  ;;  %p312_p9 = scmp.lt.s32.totalorder %s635_s17, 5 }
  0x9e   : > { %s1591_s4 = sld [smem:[#allocation27_spill]]  ;;  %s1436_s23 = scalar_lea.vmem [#allocation11], %s634_s0 }
  0x9f   : > { %s1632_s17 = smov (!%p312_p9, %s635_s17), 5  ;;  %s1592_s5 = sld [smem:[#allocation20_spill]] }
  0xa0   : > { %s636_s25 = sshll.u32 %s1632_s17, 3 }
  0xa4   : > { %s1434_s18 = scalar_lea.vmem %s1591_s4, %s636_s25 }
  0xa5   : > { %p637_p0 = scmp.ne.s32.totalorder %s1592_s5, 0 }
  0xa6   : > { %v1091_v0 = vmov (!%p637_p0), 0.0  }
  0xa7   : > { %322 = sbr.rel (%p637_p0) target bundleno = 174 (0xae), region = 44  ;;  %323 = vst [vmem:[#allocation2] sm:$0xff] (!%p637_p0), %v1091_v0  ;;  %324 = vst [vmem:[#allocation2 + $0x8] sm:$0xff] (!%p637_p0), %v1091_v0 }
  0xae PF: > { %s325_s7 = sld [smem:[#allocation4 + %s1070_s11]] }
  0xaf   : > { %s1593_s26 = sld [smem:[#allocation20_spill]] }
  0xb5   : > { %p638_p12 = scmp.ge.s32.totalorder %s1593_s26, %s325_s7 }
  0xb6   : > { %v836_v1 = vld [vmem:[%s1421_s12] sm:$0xff] (!%p638_p12)   ;;  %v1092_v2 = vmov (!%p638_p12), 0.0   ;;  %v837_v3 = vld [vmem:[%s1421_s12 + $0x8] sm:$0xff] (!%p638_p12)   ;;  %vm1093_vm0 = vmmov (!%p638_p12), 0   ;;  %v838_v4 = vld [vmem:[%s1421_s12 + $0x10] sm:$0xff] (!%p638_p12)  }
  0xb7   : > { %329 = sbr.rel (%p638_p12) target bundleno = 432 (0x1b0), region = 48  ;;  %665 = vmatprep.subr.bf16.mxu0 (!%p638_p12), %v1092_v2  ;;  %681 = vmatprep.mubr.msk.bf16.mxu0 (!%p638_p12), %vm1093_vm0, %v1092_v2  ;;  %v839_v5 = vld [vmem:[%s1421_s12 + $0x18] sm:$0xff] (!%p638_p12)   ;;  %v840_v6 = vld [vmem:[%s1421_s12 + $0x20] sm:$0xff] (!%p638_p12)   ;;  %v841_v7 = vld [vmem:[%s1421_s12 + $0x28] sm:$0xff] (!%p638_p12)  }
  0xb8   : > { %666 = vmatpush3.bf16.msra.mxu0 (!%p638_p12), %v836_v1  ;;  %v842_v8 = vld [vmem:[%s1421_s12 + $0x30] sm:$0xff] (!%p638_p12)   ;;  %v843_v9 = vld [vmem:[%s1421_s12 + $0x38] sm:$0xff] (!%p638_p12)   ;;  %v330_v11 = vld [vmem:[#allocation2] sm:$0xff] (!%p638_p12) }
  0xb9   : > { %667 = vmatprep.subr.bf16.mxu0 (!%p638_p12), %v1092_v2  ;;  %v844_v10 = vld [vmem:[%s261_s21] sm:$0xff] (!%p638_p12)   ;;  %v331_v13 = vld [vmem:[#allocation2 + $0x8] sm:$0xff] (!%p638_p12) }
  0xbc   : > { %668 = vmatpush3.bf16.msra.mxu0 (!%p638_p12), %v837_v3 }
  0xbd   : > { %669 = vmatprep.subr.bf16.mxu0 (!%p638_p12), %v1092_v2 }
  0xc0   : > { %670 = vmatpush3.bf16.msra.mxu0 %v838_v4 }
  0xc1   : > { %671 = vmatprep.subr.bf16.mxu0 %v1092_v2 }
  0xc4   : > { %672 = vmatpush3.bf16.msra.mxu0 %v839_v5 }
  0xc5   : > { %673 = vmatprep.subr.bf16.mxu0 %v1092_v2 }
  0xc8   : > { %674 = vmatpush3.bf16.msra.mxu0 %v840_v6 }
  0xc9   : > { %675 = vmatprep.subr.bf16.mxu0 %v1092_v2 }
  0xcc   : > { %676 = vmatpush3.bf16.msra.mxu0 %v841_v7 }
  0xcd   : > { %677 = vmatprep.subr.bf16.mxu0 %v1092_v2 }
  0xd0   : > { %678 = vmatpush3.bf16.msra.mxu0 %v842_v8 }
  0xd1   : > { %679 = vmatprep.subr.bf16.mxu0 %v1092_v2 }
  0xd4   : > { %680 = vmatpush3.bf16.msra.mxu0 %v843_v9 }
  0xd7   : > { %682 = vmatmul.mubr.bf16.vlgmr.msra.gmra.mrb[0].mxu0 %v844_v10 }
 0x1aa   : > { %v438_v12 = vpop.f32.mrb[0].mxu0 }
 0x1ab   : > { %v445_v14 = vadd.f32 %v438_v12, %v330_v11  ;;  %v683_v15 = vpop.f32.mrb[1].mxu0 }
 0x1ac   : > { %v441_v16 = vpop.f32.mrb[2].mxu0 }
 0x1ad   : > { %447 = vst [vmem:[#allocation2] sm:$0xff] %v445_v14  ;;  %v446_v17 = vadd.f32 %v441_v16, %v331_v13  ;;  %v684_v18 = vpop.f32.mrb[3].mxu0 }
 0x1af   : > { %448 = vst [vmem:[#allocation2 + $0x8] sm:$0xff] %v446_v17 }
 0x1b0 PF: > { %s1594_s2 = sld [smem:[#allocation20_spill]] }
 0x1b6   : > { %p648_p10 = scmp.ne.s32.totalorder %s1594_s2, 1 }
 0x1b7   : > { %v455_v19 = vld [vmem:[%s1434_s18] sm:$0xff] (!%p648_p10)  ;;  %v1094_v20 = vmov (!%p648_p10), 0   ;;  %v456_v21 = vld [vmem:[%s1434_s18 + $0x8] sm:$0xff] (!%p648_p10) }
 0x1b8   : > { %452 = sbr.rel (%p648_p10) target bundleno = 576 (0x240), region = 52  ;;  %845 = vset.pattern.permute.xlu0 (!%p648_p10), %v1094_v20  ;;  %v453_v22 = vld [vmem:[#allocation2] sm:$0xff] (!%p648_p10)  ;;  %v454_v25 = vld [vmem:[#allocation2 + $0x8] sm:$0xff] (!%p648_p10) }
 0x1b9   : > { %459 = vperm.xlu0 (!%p648_p10), %845, %v455_v19  }
 0x1bd   : > { %464 = vperm.xlu0 (!%p648_p10), %845, %v456_v21  }
 0x238   : > { %v460_v23 = vpop.permute.xlu0 %459 }
 0x239   : > { %v467_v24 = vadd.f32 %v460_v23, %v453_v22 }
 0x23b   : > { %469 = vst [vmem:[%s1436_s23] sm:$0xff] %v467_v24 }
 0x23c   : > { %v465_v26 = vpop.permute.xlu0 %464 }
 0x23d   : > { %v468_v27 = vadd.f32 %v465_v26, %v454_v25 }
 0x23f   : > { %470 = vst [vmem:[%s1436_s23 + $0x8] sm:$0xff] %v468_v27 }
 0x240 PF: > { %s655_s20 = sshll.u32 %s1070_s11, 8  ;;  %s1595_s12 = sld [smem:[#allocation28_spill]] }
 0x241   : > { %s486_s25 = sshll.u32 %s1436_s23, 4  ;;  %s1467_s10 = scalar_lea.sflag [#allocation8], %s300_s15  ;;  %s1463_s25 = int_to_ptr.vmem [resolvable:$true] %s486_s25 }
 0x242   : > { %s930_s24 = scalar_lea.vmem %s1463_s25, 256  ;;  %p1597_p6 = scmp.ne.s32.totalorder %s1581_s22, 0 }
 0x243   : > { %p931_p1 = scmp.ne.s32.totalorder %s1463_s25, %s930_s24  ;;  %s1095_s11 = smov [#allocation11]  }
 0x244   : > { %s934_s4 = sshll.u32 %s1095_s11, 4  ;;  %s935_s4 = int_to_ptr.vmem [resolvable:$false] %s934_s4 }
 0x245   : > { %p932_p11 = pnand %p931_p1, %p1597_p6  ;;  %s936_s18 = scalar_lea.vmem %s935_s4, 512 }
 0x246   : > { %s1596_s17 = smov %s1595_s12  ;;  %s1460_s0 = scalar_lea.hbm %s1595_s12, %s655_s20 }
 0x247   : > { %p933_p7 = pneg %p932_p11  ;;  %p937_p4 = scmp.lt.s32.totalorder %s1463_s25, %s935_s4 }
 0x248   : > { %p938_p3 = scmp.lt.s32.totalorder %s936_s18, %s930_s24 }
 0x24a   : > { %p939_p13 = por %p938_p3, %p937_p4 }
 0x24c   : > { %p940_p5 = pnand %p939_p13, %p933_p7 }
 0x24e   : > { %943 = shalt.err (!%p940_p5)
}
 0x24f   : > { %s944_s15 = scalar_lea.hbm %s1460_s0, 256  ;;  %s948_s7 = scalar_lea.hbm %s1596_s17, 768 }
 0x250   : > { %p945_p2 = scmp.ne.s32.totalorder %s1460_s0, %s944_s15  ;;  %p949_p0 = scmp.lt.u32.totalorder %s1460_s0, %s1596_s17 }
 0x251   : > { %p950_p12 = scmp.lt.u32.totalorder %s948_s7, %s944_s15  ;;  %p952_p1 = scmp.lt.u32.totalorder %s944_s15, %s1460_s0 }
 0x252   : > { %p946_p8 = pnand %p945_p2, %p1597_p6 }
 0x253   : > { %p951_p10 = por %p950_p12, %p949_p0 }
 0x254   : > { %p947_p9 = pneg %p946_p8 }
 0x255   : > { %p953_p11 = por %p952_p1, %p951_p10 }
 0x257   : > { %p954_p7 = pnand %p953_p11, %p947_p9 }
 0x259   : > { %957 = shalt.err (!%p954_p7)
}
 0x25a   : > { %s1096_s20 = smov 128   ;;  %s1097_s21 = smov 8  }
 0x25b   : > { %694 = dma.vmem_to_hbm [thread:$0]  (%p1597_p6), %s1463_s25, 256, %s1460_s0, %s1467_s10, %s1096_s20, %s1096_s20, %s1097_s21  }
 0x25c PF: > { %p712_p4 = scmp.ge.s32.totalorder %s1082_s14, 2  ;;  %s501_s19 = sand.u32 1, %s1030_s1  }
 0x25d   : > { %p1598_p3 = scmp.ne.s32.totalorder %s1582_s16, 0  ;;  %s502_s12 = scalar_lea.sflag [#allocation8], %s501_s19 }
 0x25f   : > { %p708_p13 = pnand %p712_p4, %p1598_p3 }
 0x261   : > { %1025 = dma.done.wait (!%p708_p13), %s502_s12, 256  }
 0x262   : > { %1027 = vsyncadd (!%p708_p13), %s502_s12, 4294967040  ;;  %s34_s14 = sadd.s32 1, %s1082_s14   ;;  %s1600_s22 = sld [smem:[#allocation25_spill]] }
 0x263   : > { %p1496_p5 = scmp.ge.s32.totalorder %s34_s14, 8   ;;  %s1601_s10 = sld [smem:[#allocation21_spill]] }
 0x264   : > { %s1602_s11 = sld [smem:[#allocation22_spill]]  ;;  %s1603_s12 = sld [smem:[#allocation23_spill]] }
 0x265   : > { %s1604_s16 = sld [smem:[#allocation24_spill]]  ;;  %s1605_s1 = smov %s1034_s27 }
 0x266   : > { %s1606_s27 = smov %s1038_s28  ;;  %s1607_s28 = smov %s1339_s29 }
 0x267   : > { %s1608_s29 = smov %s1046_s30  ;;  %s1609_s30 = smov %s1050_s6 }
 0x268   : > { %s1610_s6 = smov %s1348_s13  ;;  %s1611_s7 = smov %s1058_s8 }
 0x269   : > { %s1612_s8 = smov %s1062_s9  ;;  %s1613_s9 = smov %s1600_s22 }
 0x26a   :  { %33 = sbr.rel (!%p1496_p5) target bundleno = 39 (0x27), region = 105 }
 0x26b   : > { %s1614_s13 = smov %s1604_s16 }
 0x271   :  { %507 = vsyncpa [#allocation7], 1 }
 0x272   :  { %509 = vsyncpa [#allocation7 + $0x1], 1 }
 0x273   :  { %510 = vsyncpa [#allocation10], 1 }
 0x274   :  { %512 = vsyncpa [#allocation10 + $0x1], 1 }
 0x275   :  { %513 = vsyncpa [#allocation8], 1 }
 0x276   :  { %515 = vsyncpa [#allocation8 + $0x1], 1 }

</bundles_post_ra>
